<compile_context>
chip_gen: v5e
topology: v5e:2x2
jax: 0.10.0
libtpu: 0.0.40
codegen_flags: <defaults>
</compile_context>

<pallas_src>
import jax
import jax.numpy as jnp
from jax.experimental import pallas as pl
from jax.experimental.pallas import tpu as pltpu


# Flip to True after verifying in xprof that plain "parallel" does NOT place
# the two batch steps on both v7x TensorCores.
_V7X_USE_CORE_PARALLEL = False


# ----------------------------- Pallas kernel -------------------------------- #
def omics_net_kernel(x1_ref, x2_ref, w_ref, b_ref, w5b_ref, out_ref):
    """Batch-on-lanes eval forward.

    x1_ref : (D, Bt)   bf16  transposed, feature-padded omics tile
    x2_ref : (1, Bt)   f32   transposed clinical covariate (age)
    w_ref  : (4, D, D) bf16  BN-folded Linear weights (torch (out, in) layout)
    b_ref  : (5, D, 1) f32   rows 0-3: BN-folded biases, row 4: hidden2 w5a
    w5b_ref: (1,)      f32   SMEM scalar, hidden2 weight on the clinical column
    out_ref: (1, Bt)   f32   lane-dense prediction row
    """
    h_bf16 = x1_ref[...]
    h_f32 = None
    for l in range(4):
        # MXU: bf16 x bf16 -> f32 accumulate.  Zero padding in w_ref rows/cols
        # keeps padded feature sublanes exactly zero through the chain.
        y = jnp.dot(w_ref[l], h_bf16, preferred_element_type=jnp.float32)
        h_f32 = jnp.maximum(y + b_ref[l], 0.0)     # bias (BN folded) + ReLU, f32
        h_bf16 = h_f32.astype(jnp.bfloat16)

    # hidden2(concat(h, x2)), no bias:  N=1 output -> VPU multiply + XLU
    # sublane reduce instead of a wasteful single-column MXU push.
    pred = jnp.sum(h_f32 * b_ref[4], axis=0, keepdims=True)     # (1, Bt)
    out_ref[...] = pred + x2_ref[...] * w5b_ref[0]


# ------------------------------ wrapper -------------------------------------- #
def _default_tiling(batch):
    """v5e/v6e: 1 TensorCore -> a 2nd grid step is pure serialized overhead, so
    run the whole batch in a single step.  v7x: 2 TensorCores -> keep 2 steps
    and let megacore sharding place one on each core."""
    kind = ""
    try:
        kind = jax.devices()[0].device_kind.lower()
    except Exception:
        pass
    is_v7 = ("v7" in kind) or ("7x" in kind)
    if is_v7 and batch % 256 == 0:
        # TODO(synk): confirm in xprof that both TCs get a step; if a single TC
        # runs both, flip _V7X_USE_CORE_PARALLEL (or use pl.core_map over a
        # pltpu.create_tensorcore_mesh and split the batch explicitly).
        sem = (pltpu.CORE_PARALLEL,) if _V7X_USE_CORE_PARALLEL else ("parallel",)
        return batch // 2, sem
    return batch, ("arbitrary",)


def omics_net_forward(x1, x2, params, *, batch_tile=None):
    """x1: [B, in_nodes] f32, x2: [B, 1] f32 (clinical / age covariate)."""
    B, in_nodes = x1.shape
    D = params["feat_pad"]
    w_slab, b_slab, w5b = params["w_slab"], params["b_slab"], params["w5b"]

    if batch_tile is None:
        batch_tile, dim_sem = _default_tiling(B)
    else:
        dim_sem = ("arbitrary",) if batch_tile == B else ("parallel",)
    assert B % batch_tile == 0 and batch_tile % 128 == 0, \
        "batch must tile into 128-lane multiples"

    # Layout plumbing (not compute): transpose + feature-pad + bf16-cast so the
    # kernel sees lane-dense (features x batch) tiles and a lane-dense output.
    x1_t = jnp.zeros((D, B), jnp.bfloat16)
    x1_t = x1_t.at[:in_nodes, :].set(x1.T.astype(jnp.bfloat16))
    x2_t = x2.T.astype(jnp.float32)                               # (1, B)

    def resident(arr):   # full-array block, same block every grid step
        nd = arr.ndim
        return pl.BlockSpec(arr.shape, lambda i, _nd=nd: (0,) * _nd)

    out = pl.pallas_call(
        omics_net_kernel,
        grid=(B // batch_tile,),
        in_specs=[
            pl.BlockSpec((D, batch_tile), lambda i: (0, i)),      # x1_t tile
            pl.BlockSpec((1, batch_tile), lambda i: (0, i)),      # x2_t tile
            resident(w_slab),                                     # packed weights
            resident(b_slab),                                     # packed biases + w5a
            pl.BlockSpec(memory_space=pltpu.MemorySpace.SMEM),    # w5b scalar
        ],
        out_specs=pl.BlockSpec((1, batch_tile), lambda i: (0, i)),
        out_shape=jax.ShapeDtypeStruct((1, B), jnp.float32),
        compiler_params=pltpu.CompilerParams(dimension_semantics=dim_sem),
    )(x1_t, x2_t, w_slab, b_slab, w5b)

    return out.reshape(B, 1)


# -------------------------- parameter construction --------------------------- #
def make_raw_params(key, in_nodes, gene_nodes, pathway_nodes, hidden_nodes):
    """Torch-layout synthetic params mirroring the nn.Module __init__ shapes."""
    ks = jax.random.split(key, 28)
    f32 = jnp.float32

    def linear(kw, kb, fan_in, fan_out, with_bias=True):
        bound = 1.0 / jnp.sqrt(jnp.asarray(fan_in, f32))
        w = jax.random.uniform(kw, (fan_out, fan_in), f32, -bound, bound)
        b = (jax.random.uniform(kb, (fan_out,), f32, -bound, bound)
             if with_bias else None)
        return w, b

    w1, b1 = linear(ks[0], ks[1], in_nodes, gene_nodes)
    w2, b2 = linear(ks[2], ks[3], gene_nodes, pathway_nodes)
    w3, b3 = linear(ks[4], ks[5], pathway_nodes, hidden_nodes[0])
    w4, b4 = linear(ks[6], ks[7], hidden_nodes[0], hidden_nodes[1])
    w5, _ = linear(ks[8], ks[9], hidden_nodes[1] + 1, 1, with_bias=False)

    # fixed_s_mask: fixed sparse gene / pathway connectivity masks on the weights.
    gene_mask = (jax.random.uniform(ks[10], (gene_nodes, in_nodes)) > 0.3).astype(f32)
    path_mask = (jax.random.uniform(ks[11], (pathway_nodes, gene_nodes)) > 0.3).astype(f32)
    w1 = w1 * gene_mask
    w2 = w2 * path_mask

    def bn(kg, kb, km, kv, n):
        gamma = jax.random.uniform(kg, (n,), f32, 0.5, 1.5)
        beta = jax.random.uniform(kb, (n,), f32, -0.5, 0.5)
        mean = jax.random.normal(km, (n,), f32) * 0.1
        var = jax.random.uniform(kv, (n,), f32, 0.5, 1.5)
        return gamma, beta, mean, var

    bn1 = bn(ks[12], ks[13], ks[14], ks[15], gene_nodes)
    bn2 = bn(ks[16], ks[17], ks[18], ks[19], pathway_nodes)
    bn3 = bn(ks[20], ks[21], ks[22], ks[23], hidden_nodes[0])
    bn4 = bn(ks[24], ks[25], ks[26], ks[27], hidden_nodes[1])

    return {
        "w1": w1, "b1": b1, "bn1": bn1,
        "w2": w2, "b2": b2, "bn2": bn2,
        "w3": w3, "b3": b3, "bn3": bn3,
        "w4": w4, "b4": b4, "bn4": bn4,
        "w5": w5,
    }


def prepare_kernel_params(raw, hidden_nodes, eps=1e-5):
    """Fold eval-mode BN into each Linear and pack everything into two slabs."""
    h1 = hidden_nodes[1]
    layers = [("w1", "b1", "bn1"), ("w2", "b2", "bn2"),
              ("w3", "b3", "bn3"), ("w4", "b4", "bn4")]

    # Common padded feature tile D: covers every in/out dim, multiple of 16 so
    # bf16 sublane slices stay tile-aligned.
    D = 0
    for wk, _, _ in layers:
        o, i = raw[wk].shape
        D = max(D, o, i)
    D = ((D + 15) // 16) * 16

    w_slab = jnp.zeros((4, D, D), jnp.float32)
    b_slab = jnp.zeros((5, D, 1), jnp.float32)
    for l, (wk, bk, bnk) in enumerate(layers):
        w, b = raw[wk], raw[bk]
        gamma, beta, mean, var = raw[bnk]
        s = gamma / jnp.sqrt(var + eps)          # per-output-feature scale
        t = beta - mean * s                      # per-output-feature shift
        wf = w * s[:, None]                      # (out, in), torch layout kept
        bf = b * s + t                           # (out,)
        o, i = wf.shape
        w_slab = w_slab.at[l, :o, :i].set(wf)
        b_slab = b_slab.at[l, :o, 0].set(bf)

    w5 = raw["w5"]                               # (1, h1 + 1), no bias
    b_slab = b_slab.at[4, :h1, 0].set(w5[0, :h1])   # hidden2 weights on h

    return {
        "w_slab": w_slab.astype(jnp.bfloat16),   # bf16 MXU operands
        "b_slab": b_slab,                        # f32 epilogue + head row
        "w5b": w5[0, h1:h1 + 1].astype(jnp.float32),  # (1,) clinical scalar -> SMEM
        "feat_pad": D,
    }


# ------------------------------ pure-JAX reference --------------------------- #
def reference_forward(x1, x2, raw, eps=1e-5):
    """Unfolded eval-mode forward: Linear -> BN(eval) -> ReLU, then hidden2."""
    def layer(x, w, b, bn_params):
        gamma, beta, mean, var = bn_params
        y = x @ w.T + b
        y = (y - mean) / jnp.sqrt(var + eps) * gamma + beta
        return jnp.maximum(y, 0.0)

    h = layer(x1, raw["w1"], raw["b1"], raw["bn1"])
    h = layer(h, raw["w2"], raw["b2"], raw["bn2"])
    h = layer(h, raw["w3"], raw["b3"], raw["bn3"])
    h = layer(h, raw["w4"], raw["b4"], raw["bn4"])
    x_cat = jnp.concatenate([h, x2], axis=1)
    return x_cat @ raw["w5"].T


if __name__ == "__main__":
    # Small feature dims consistent with the module; batch fills the 128-lane
    # axis (and both v7x TensorCores when the 2-step split kicks in).
    B = 256
    in_nodes, gene_nodes, pathway_nodes = 32, 24, 16
    hidden_nodes = (32, 16)

    key = jax.random.PRNGKey(0)
    k_x1, k_x2, k_p = jax.random.split(key, 3)

    x1 = jax.random.normal(k_x1, (B, in_nodes), jnp.float32)
    x2 = jax.random.normal(k_x2, (B, 1), jnp.float32)    # clinical covariate (age)

    raw = make_raw_params(k_p, in_nodes, gene_nodes, pathway_nodes, hidden_nodes)
    params = prepare_kernel_params(raw, hidden_nodes)

    out = omics_net_forward(x1, x2, params)
    out = jax.block_until_ready(out)

    ref = reference_forward(x1, x2, raw)
    assert out.shape == (B, 1)
    # bf16 MXU operands with f32 accumulation: loosened tolerance per review.
    assert jnp.allclose(out, ref, atol=5e-2, rtol=5e-2), \
        "mismatch vs pure-JAX reference (bf16 tolerance)"

    print("KERNEL_OK")
</pallas_src>

<mosaic_0001>
module attributes {stable_mosaic.version = 11 : i64} {
  func.func @omics_net_kernel(%arg0: i32, %arg1: memref<32x256xbf16, #tpu.memory_space<vmem>>, %arg2: memref<1x256xf32, #tpu.memory_space<vmem>>, %arg3: memref<4x32x32xbf16, #tpu.memory_space<vmem>>, %arg4: memref<5x32x1xf32, #tpu.memory_space<vmem>>, %arg5: memref<1xf32, #tpu.memory_space<smem>>, %arg6: memref<1x256xf32, #tpu.memory_space<vmem>>) attributes {dimension_semantics = [#tpu.dimension_semantics<arbitrary>], iteration_bounds = array<i64: 1>, scalar_prefetch = 0 : i64, scratch_operands = 0 : i64, tpu.core_type = #tpu.core_type<tc>, window_params = [{transform_indices = @transform_0, window_bounds = array<i64: 32, 256>}, {transform_indices = @transform_1, window_bounds = array<i64: 1, 256>}, {pipeline_mode = #tpu.pipeline_mode<synchronous>, transform_indices = @transform_2, window_bounds = array<i64: 4, 32, 32>}, {pipeline_mode = #tpu.pipeline_mode<synchronous>, transform_indices = @transform_3, window_bounds = array<i64: 5, 32, 1>}, {transform_indices = @transform_4, window_bounds = array<i64: 1>}, {transform_indices = @transform_5, window_bounds = array<i64: 1, 256>}]} {
    %c0 = arith.constant 0 : index
    %c0_0 = arith.constant 0 : index
    %0 = vector.load %arg1[%c0, %c0_0] : memref<32x256xbf16, #tpu.memory_space<vmem>>, vector<32x256xbf16>
    %c0_1 = arith.constant 0 : index
    %c0_2 = arith.constant 0 : index
    %c0_3 = arith.constant 0 : index
    %1 = vector.load %arg3[%c0_1, %c0_2, %c0_3] : memref<4x32x32xbf16, #tpu.memory_space<vmem>>, vector<1x32x32xbf16>
    %2 = vector.shape_cast %1 : vector<1x32x32xbf16> to vector<32x32xbf16>
    %cst = arith.constant dense<0.000000e+00> : vector<32x256xf32>
    %3 = tpu.matmul %2, %0, %cst {dimension_numbers = #tpu.dot_dimension_numbers<[1], [0], [0], [1], [0, 0, 1, 1], [], []>} : vector<32x32xbf16>, vector<32x256xbf16>, vector<32x256xf32> -> vector<32x256xf32>
    %c0_4 = arith.constant 0 : index
    %c0_5 = arith.constant 0 : index
    %c0_6 = arith.constant 0 : index
    %4 = vector.load %arg4[%c0_4, %c0_5, %c0_6] : memref<5x32x1xf32, #tpu.memory_space<vmem>>, vector<1x32x1xf32>
    %5 = vector.shape_cast %4 : vector<1x32x1xf32> to vector<32x1xf32>
    %6 = vector.broadcast %5 : vector<32x1xf32> to vector<32x256xf32>
    %7 = arith.addf %3, %6 : vector<32x256xf32>
    %cst_7 = arith.constant 0.000000e+00 : f32
    %8 = vector.broadcast %cst_7 : f32 to vector<32x256xf32>
    %9 = arith.maximumf %7, %8 : vector<32x256xf32>
    %10 = arith.truncf %9 : vector<32x256xf32> to vector<32x256xbf16>
    %c1 = arith.constant 1 : index
    %c0_8 = arith.constant 0 : index
    %c0_9 = arith.constant 0 : index
    %11 = vector.load %arg3[%c1, %c0_8, %c0_9] : memref<4x32x32xbf16, #tpu.memory_space<vmem>>, vector<1x32x32xbf16>
    %12 = vector.shape_cast %11 : vector<1x32x32xbf16> to vector<32x32xbf16>
    %cst_10 = arith.constant dense<0.000000e+00> : vector<32x256xf32>
    %13 = tpu.matmul %12, %10, %cst_10 {dimension_numbers = #tpu.dot_dimension_numbers<[1], [0], [0], [1], [0, 0, 1, 1], [], []>} : vector<32x32xbf16>, vector<32x256xbf16>, vector<32x256xf32> -> vector<32x256xf32>
    %c1_11 = arith.constant 1 : index
    %c0_12 = arith.constant 0 : index
    %c0_13 = arith.constant 0 : index
    %14 = vector.load %arg4[%c1_11, %c0_12, %c0_13] : memref<5x32x1xf32, #tpu.memory_space<vmem>>, vector<1x32x1xf32>
    %15 = vector.shape_cast %14 : vector<1x32x1xf32> to vector<32x1xf32>
    %16 = vector.broadcast %15 : vector<32x1xf32> to vector<32x256xf32>
    %17 = arith.addf %13, %16 : vector<32x256xf32>
    %cst_14 = arith.constant 0.000000e+00 : f32
    %18 = vector.broadcast %cst_14 : f32 to vector<32x256xf32>
    %19 = arith.maximumf %17, %18 : vector<32x256xf32>
    %20 = arith.truncf %19 : vector<32x256xf32> to vector<32x256xbf16>
    %c2 = arith.constant 2 : index
    %c0_15 = arith.constant 0 : index
    %c0_16 = arith.constant 0 : index
    %21 = vector.load %arg3[%c2, %c0_15, %c0_16] : memref<4x32x32xbf16, #tpu.memory_space<vmem>>, vector<1x32x32xbf16>
    %22 = vector.shape_cast %21 : vector<1x32x32xbf16> to vector<32x32xbf16>
    %cst_17 = arith.constant dense<0.000000e+00> : vector<32x256xf32>
    %23 = tpu.matmul %22, %20, %cst_17 {dimension_numbers = #tpu.dot_dimension_numbers<[1], [0], [0], [1], [0, 0, 1, 1], [], []>} : vector<32x32xbf16>, vector<32x256xbf16>, vector<32x256xf32> -> vector<32x256xf32>
    %c2_18 = arith.constant 2 : index
    %c0_19 = arith.constant 0 : index
    %c0_20 = arith.constant 0 : index
    %24 = vector.load %arg4[%c2_18, %c0_19, %c0_20] : memref<5x32x1xf32, #tpu.memory_space<vmem>>, vector<1x32x1xf32>
    %25 = vector.shape_cast %24 : vector<1x32x1xf32> to vector<32x1xf32>
    %26 = vector.broadcast %25 : vector<32x1xf32> to vector<32x256xf32>
    %27 = arith.addf %23, %26 : vector<32x256xf32>
    %cst_21 = arith.constant 0.000000e+00 : f32
    %28 = vector.broadcast %cst_21 : f32 to vector<32x256xf32>
    %29 = arith.maximumf %27, %28 : vector<32x256xf32>
    %30 = arith.truncf %29 : vector<32x256xf32> to vector<32x256xbf16>
    %c3 = arith.constant 3 : index
    %c0_22 = arith.constant 0 : index
    %c0_23 = arith.constant 0 : index
    %31 = vector.load %arg3[%c3, %c0_22, %c0_23] : memref<4x32x32xbf16, #tpu.memory_space<vmem>>, vector<1x32x32xbf16>
    %32 = vector.shape_cast %31 : vector<1x32x32xbf16> to vector<32x32xbf16>
    %cst_24 = arith.constant dense<0.000000e+00> : vector<32x256xf32>
    %33 = tpu.matmul %32, %30, %cst_24 {dimension_numbers = #tpu.dot_dimension_numbers<[1], [0], [0], [1], [0, 0, 1, 1], [], []>} : vector<32x32xbf16>, vector<32x256xbf16>, vector<32x256xf32> -> vector<32x256xf32>
    %c3_25 = arith.constant 3 : index
    %c0_26 = arith.constant 0 : index
    %c0_27 = arith.constant 0 : index
    %34 = vector.load %arg4[%c3_25, %c0_26, %c0_27] : memref<5x32x1xf32, #tpu.memory_space<vmem>>, vector<1x32x1xf32>
    %35 = vector.shape_cast %34 : vector<1x32x1xf32> to vector<32x1xf32>
    %36 = vector.broadcast %35 : vector<32x1xf32> to vector<32x256xf32>
    %37 = arith.addf %33, %36 : vector<32x256xf32>
    %cst_28 = arith.constant 0.000000e+00 : f32
    %38 = vector.broadcast %cst_28 : f32 to vector<32x256xf32>
    %39 = arith.maximumf %37, %38 : vector<32x256xf32>
    %c4 = arith.constant 4 : index
    %c0_29 = arith.constant 0 : index
    %c0_30 = arith.constant 0 : index
    %40 = vector.load %arg4[%c4, %c0_29, %c0_30] : memref<5x32x1xf32, #tpu.memory_space<vmem>>, vector<1x32x1xf32>
    %41 = vector.shape_cast %40 : vector<1x32x1xf32> to vector<32x1xf32>
    %42 = vector.broadcast %41 : vector<32x1xf32> to vector<32x256xf32>
    %43 = arith.mulf %39, %42 : vector<32x256xf32>
    %cst_31 = arith.constant dense<0.000000e+00> : vector<256xf32>
    %44 = vector.multi_reduction <add>, %43, %cst_31 [0] : vector<32x256xf32> to vector<256xf32>
    %45 = vector.shape_cast %44 : vector<256xf32> to vector<1x256xf32>
    %c0_32 = arith.constant 0 : index
    %c0_33 = arith.constant 0 : index
    %46 = vector.load %arg2[%c0_32, %c0_33] : memref<1x256xf32, #tpu.memory_space<vmem>>, vector<1x256xf32>
    %c0_34 = arith.constant 0 : index
    %47 = memref.load %arg5[%c0_34] : memref<1xf32, #tpu.memory_space<smem>>
    %48 = vector.broadcast %47 : f32 to vector<1x256xf32>
    %49 = arith.mulf %46, %48 : vector<1x256xf32>
    %50 = arith.addf %45, %49 : vector<1x256xf32>
    %c0_35 = arith.constant 0 : index
    %c0_36 = arith.constant 0 : index
    %51 = vector.load %arg6[%c0_35, %c0_36] : memref<1x256xf32, #tpu.memory_space<vmem>>, vector<1x256xf32>
    tpu.vector_store %arg6[%c0_35, %c0_36], %50 {strides = array<i32>} : memref<1x256xf32, #tpu.memory_space<vmem>>, vector<1x256xf32>,
    return
  }
  func.func @transform_0(%arg0: i32) -> (i32, i32) {
    %c0_i32 = arith.constant 0 : i32
    %c0_i32_0 = arith.constant 0 : i32
    return %c0_i32, %arg0 : i32, i32
  }
  func.func @transform_1(%arg0: i32) -> (i32, i32) {
    %c0_i32 = arith.constant 0 : i32
    %c0_i32_0 = arith.constant 0 : i32
    return %c0_i32, %arg0 : i32, i32
  }
  func.func @transform_2(%arg0: i32) -> (i32, i32, i32) {
    %c0_i32 = arith.constant 0 : i32
    %c0_i32_0 = arith.constant 0 : i32
    %c0_i32_1 = arith.constant 0 : i32
    %c0_i32_2 = arith.constant 0 : i32
    return %c0_i32, %c0_i32_0, %c0_i32_1 : i32, i32, i32
  }
  func.func @transform_3(%arg0: i32) -> (i32, i32, i32) {
    %c0_i32 = arith.constant 0 : i32
    %c0_i32_0 = arith.constant 0 : i32
    %c0_i32_1 = arith.constant 0 : i32
    %c0_i32_2 = arith.constant 0 : i32
    return %c0_i32, %c0_i32_0, %c0_i32_1 : i32, i32, i32
  }
  func.func @transform_4(%arg0: i32) -> i32 {
    %c0_i32 = arith.constant 0 : i32
    %c0_i32_0 = arith.constant 0 : i32
    return %c0_i32 : i32
  }
  func.func @transform_5(%arg0: i32) -> (i32, i32) {
    %c0_i32 = arith.constant 0 : i32
    %c0_i32_0 = arith.constant 0 : i32
    return %c0_i32, %arg0 : i32, i32
  }
}

</mosaic_0001>

<bundles_post_ra>
// kernel: tpu_custom_call.1
= control target key start
LH: loop header
LB: loop body
LE: loop exit
PB: predicated region body
PF: predicated region fallthrough
CT: control target
= control target key end

     0   :  { %v650_v3 = vmov 0   ;;  %s815_s0 = inlined_call_operand.vmem [shape: bf16[32,256], index: 0, kind: input, shape index: {}]   ;;  %s816_s1 = inlined_call_operand.vmem [shape: f32[1,256], index: 1, kind: input, shape index: {}]   ;;  %s817_s2 = inlined_call_operand.vmem [shape: bf16[4,32,32], index: 2, kind: input, shape index: {}]   ;;  %s818_s3 = inlined_call_operand.vmem [shape: f32[5,32,1], index: 3, kind: input, shape index: {}]   ;;  %s819_s4 = inlined_call_operand.<no memory space> [shape: f32[1], index: 4, kind: input, shape index: {}]   ;;  %s820_s5 = inlined_call_operand.hbm [shape: f32[1,256], index: 5, kind: output, shape index: {}]  }
   0x1   :  { %v33_v0 = vld [vmem:[%s818_s3 + $0x10] sm:$0xff]  ;;  %v31_v1 = vld [vmem:[%s818_s3] sm:$0xff]  ;;  %622 = vset.pattern.permute.xlu1 %v650_v3  ;;  %621 = vset.pattern.permute.xlu0 %v650_v3  ;;  %v610_v4 = vld [vmem:[%s815_s0 + $0x14] sm:$0xf0] }
   0x2   :  { %v533_v2 = vld [vmem:[%s815_s0 + $0x10] sm:$0xf]  ;;  %v609_v5 = vld [vmem:[%s815_s0 + $0x14] sm:$0xf]  ;;  %v535_v6 = vld [vmem:[%s815_s0 + $0x18] sm:$0xf0]  ;;  %47 = vperm.xlu0 %621, %v33_v0   ;;  %37 = vperm.xlu1 %622, %v31_v1  }
   0x3   :  { %v534_v7 = vor.u32 %v610_v4, %v533_v2  ;;  %v538_v8 = vor.u32 %v609_v5, %v535_v6  ;;  %v525_v9 = vld [vmem:[%s815_s0] sm:$0xf]  ;;  %v608_v10 = vld [vmem:[%s815_s0 + $0x4] sm:$0xf0]  ;;  %v607_v11 = vld [vmem:[%s815_s0 + $0x4] sm:$0xf]  ;;  %623 = vset.pattern.permute.xlu2 %v650_v3 }
   0x4   :  { %v527_v12 = vld [vmem:[%s815_s0 + $0x8] sm:$0xf0]  ;;  %v526_v13 = vor.u32 %v608_v10, %v525_v9  ;;  %v34_v15 = vld [vmem:[%s818_s3 + $0x18] sm:$0xff]  ;;  %v611_v17 = vld [vmem:[%s817_s2] sm:$0xff] }
   0x5   :  { %98 = vmatpush.bf16.msra.mxu0 %v534_v7  ;;  %117 = vmatpush.bf16.msra.mxu1 %v538_v8  ;;  %v530_v14 = vor.u32 %v607_v11, %v527_v12  ;;  %v32_v16 = vld [vmem:[%s818_s3 + $0x8] sm:$0xff] }
   0x6   :  { %11 = vsyncpa [#allocation4], 0  ;;  %vm85_vm0 = vcmask 261120   ;;  %v547_v18 = vld [vmem:[%s818_s3 + $0x20] sm:$0xff]  ;;  %v548_v19 = vld [vmem:[%s818_s3 + $0x28] sm:$0xff]  ;;  %vm491_vm1 = vcmask 1040384  }
   0x7   :  { %v570_v20 = vld [vmem:[%s818_s3 + $0x58] sm:$0xff]  ;;  %v567_v21 = vld [vmem:[%s818_s3 + $0x40] sm:$0xff]  ;;  %v612_v22 = vld [vmem:[%s817_s2 + $0x8] sm:$0xff] }
   0x8   :  { %v587_v23 = vld [vmem:[%s818_s3 + $0x60] sm:$0xff]  ;;  %v588_v24 = vld [vmem:[%s818_s3 + $0x68] sm:$0xff]  ;;  %v590_v25 = vld [vmem:[%s818_s3 + $0x78] sm:$0xff] }
   0x9   :  { %99 = vmatpush.bf16.msra.mxu0 %v526_v13  ;;  %118 = vmatpush.bf16.msra.mxu1 %v530_v14  ;;  %v603_v26 = vld [vmem:[%s818_s3 + $0x80] sm:$0xff]  ;;  %v605_v27 = vld [vmem:[%s818_s3 + $0x90] sm:$0xff]  ;;  %v606_v28 = vld [vmem:[%s818_s3 + $0x98] sm:$0xff] }
   0xa   :  { %52 = vperm.xlu0 %621, %v34_v15   ;;  %42 = vperm.xlu1 %622, %v32_v16   ;;  %v549_v37 = vld [vmem:[%s818_s3 + $0x30] sm:$0xff]  ;;  %v550_v58 = vld [vmem:[%s818_s3 + $0x38] sm:$0xff]  ;;  %v568_v1 = vld [vmem:[%s818_s3 + $0x48] sm:$0xff] }
   0xb   :  { %164 = vperm.xlu2 %623, %v549_v37   ;;  %v613_v63 = vld [vmem:[%s817_s2 + $0x10] sm:$0xff]  ;;  %v614_v2 = vld [vmem:[%s817_s2 + $0x18] sm:$0xff]  ;;  %v604_v4 = vld [vmem:[%s818_s3 + $0x88] sm:$0xff] }
   0xc   :  { %539 = vmatmul.msk.bf16.vlgmr.msra.gmra.mxu0 %vm85_vm0, %v611_v17  ;;  %541 = vmatmul.msk.bf16.vlgmr.msra.gmra.mxu1 %vm85_vm0, %v611_v17  ;;  %v569_v0 = vld [vmem:[%s818_s3 + $0x50] sm:$0xff]  ;;  %v615_v37 = vld [vmem:[%s817_s2 + $0x20] sm:$0xff] }
   0xd   :  { %v589_v3 = vld [vmem:[%s818_s3 + $0x70] sm:$0xff] }
  0x12   :  { %154 = vperm.xlu0 %621, %v547_v18   ;;  %159 = vperm.xlu1 %622, %v548_v19  }
  0x13   :  { %169 = vperm.xlu2 %623, %v550_v58  }
  0x1a   :  { %265 = vperm.xlu0 %621, %v570_v20   ;;  %250 = vperm.xlu1 %622, %v567_v21  }
  0x1b   :  { %260 = vperm.xlu2 %623, %v569_v0  }
  0x1c   :  { %540 = vmatmul.msk.bf16.gmra.mxu0 %vm85_vm0, %v612_v22  ;;  %542 = vmatmul.msk.bf16.gmra.mxu1 %vm85_vm0, %v612_v22 }
  0x22   :  { %346 = vperm.xlu0 %621, %v587_v23   ;;  %351 = vperm.xlu1 %622, %v588_v24  }
  0x23   :  { %255 = vperm.xlu2 %623, %v568_v1  }
  0x2a   :  { %361 = vperm.xlu0 %621, %v590_v25   ;;  %433 = vperm.xlu1 %622, %v603_v26  }
  0x2b   :  { %356 = vperm.xlu2 %623, %v589_v3  }
  0x32   :  { %443 = vperm.xlu0 %621, %v605_v27   ;;  %448 = vperm.xlu1 %622, %v606_v28  }
  0x33   :  { %438 = vperm.xlu2 %623, %v604_v4  }
  0x65   :  { %v165_v9 = vpop.permute.xlu2 %164 }
  0x6d   :  { %v170_v13 = vpop.permute.xlu2 %169 }
  0x74   :  { %v48_v33 = vpop.permute.xlu0 %47  ;;  %v38_v34 = vpop.permute.xlu1 %37 }
  0x7c   :  { %v53_v38 = vpop.permute.xlu0 %52  ;;  %v43_v39 = vpop.permute.xlu1 %42 }
  0x84   :  { %v160_v12 = vpop.permute.xlu1 %159  ;;  %v155_v18 = vpop.permute.xlu0 %154 }
  0x89   :  { %v101_v29 = vpop.f32.mrf.mxu0  ;;  %v120_v30 = vpop.f32.mrf.mxu1 }
  0x8a   :  { %v102_v48 = vadd.f32 %v101_v29, %v38_v34  ;;  %v121_v49 = vadd.f32 %v120_v30, %v38_v34 }
  0x8c   :  { %v130_v59 = vmax.f32 %v102_v48, 0.0  ;;  %v131_v60 = vmax.f32 %v121_v49, 0.0 }
  0x91   :  { %v103_v31 = vpop.f32.mrf.mxu0  ;;  %v122_v32 = vpop.f32.mrf.mxu1 }
  0x92   :  { %v104_v44 = vadd.f32 %v103_v31, %v43_v39  ;;  %v123_v45 = vadd.f32 %v122_v32, %v43_v39 }
  0x94   :  { %v132_v54 = vmax.f32 %v104_v44, 0.0  ;;  %v133_v55 = vmax.f32 %v123_v45, 0.0 }
  0x96   :  { %v138_v61 = vpack.c.bf16 %v132_v54, %v130_v59  ;;  %v139_v62 = vpack.c.bf16 %v133_v55, %v131_v60 }
  0x99   :  { %v106_v35 = vpop.f32.mrf.mxu0  ;;  %v125_v36 = vpop.f32.mrf.mxu1 }
  0x9a   :  { %v107_v40 = vadd.f32 %v106_v35, %v48_v33  ;;  %v126_v41 = vadd.f32 %v125_v36, %v48_v33 }
  0x9c   :  { %v134_v50 = vmax.f32 %v107_v40, 0.0  ;;  %v135_v51 = vmax.f32 %v126_v41, 0.0 }
  0xa1   :  { %v108_v42 = vpop.f32.mrf.mxu0  ;;  %v127_v43 = vpop.f32.mrf.mxu1 }
  0xa2   :  { %v109_v46 = vadd.f32 %v108_v42, %v53_v38  ;;  %v128_v47 = vadd.f32 %v127_v43, %v53_v38  ;;  %v616_v38 = vld [vmem:[%s817_s2 + $0x28] sm:$0xff]  ;;  %v261_v43 = vpop.permute.xlu2 %260 }
  0xa4   :  { %v136_v52 = vmax.f32 %v109_v46, 0.0  ;;  %v137_v53 = vmax.f32 %v128_v47, 0.0  ;;  %v266_v46 = vpop.permute.xlu0 %265 }
  0xa6   :  { %v140_v56 = vpack.c.bf16 %v136_v52, %v134_v50  ;;  %v141_v57 = vpack.c.bf16 %v137_v53, %v135_v51  ;;  %v251_v52 = vpop.permute.xlu1 %250 }
  0xa8   :  { %194 = vmatpush.bf16.msra.mxu2 %v140_v56  ;;  %213 = vmatpush.bf16.msra.mxu3 %v141_v57 }
  0xaa   :  { %v256_v47 = vpop.permute.xlu2 %255 }
  0xac   :  { %195 = vmatpush.bf16.msra.mxu2 %v138_v61  ;;  %214 = vmatpush.bf16.msra.mxu3 %v139_v62 }
  0xaf   :  { %559 = vmatmul.msk.bf16.vlgmr.msra.gmra.mxu2 %vm85_vm0, %v613_v63  ;;  %561 = vmatmul.msk.bf16.vlgmr.msra.gmra.mxu3 %vm85_vm0, %v613_v63 }
  0xbf   :  { %560 = vmatmul.msk.bf16.gmra.mxu2 %vm85_vm0, %v614_v2  ;;  %562 = vmatmul.msk.bf16.gmra.mxu3 %vm85_vm0, %v614_v2 }
 0x132   :  { %v197_v5 = vpop.f32.mrf.mxu2  ;;  %v216_v6 = vpop.f32.mrf.mxu3 }
 0x133   :  { %v198_v23 = vadd.f32 %v197_v5, %v155_v18  ;;  %v217_v24 = vadd.f32 %v216_v6, %v155_v18 }
 0x135   :  { %v226_v33 = vmax.f32 %v198_v23, 0.0  ;;  %v227_v34 = vmax.f32 %v217_v24, 0.0 }
 0x13a   :  { %v199_v7 = vpop.f32.mrf.mxu2  ;;  %v218_v8 = vpop.f32.mrf.mxu3 }
 0x13b   :  { %v200_v19 = vadd.f32 %v199_v7, %v160_v12  ;;  %v219_v20 = vadd.f32 %v218_v8, %v160_v12  ;;  %v617_v7 = vld [vmem:[%s817_s2 + $0x30] sm:$0xff]  ;;  %v618_v8 = vld [vmem:[%s817_s2 + $0x38] sm:$0xff]  ;;  %v352_v12 = vpop.permute.xlu1 %351 }
 0x13d   :  { %v228_v29 = vmax.f32 %v200_v19, 0.0  ;;  %v229_v30 = vmax.f32 %v219_v20, 0.0 }
 0x13f   :  { %v234_v35 = vpack.c.bf16 %v228_v29, %v226_v33  ;;  %v235_v36 = vpack.c.bf16 %v229_v30, %v227_v34 }
 0x142   :  { %v202_v10 = vpop.f32.mrf.mxu2  ;;  %v221_v11 = vpop.f32.mrf.mxu3 }
 0x143   :  { %v203_v14 = vadd.f32 %v202_v10, %v165_v9  ;;  %v222_v15 = vadd.f32 %v221_v11, %v165_v9  ;;  %v347_v11 = vpop.permute.xlu0 %346 }
 0x145   :  { %v230_v25 = vmax.f32 %v203_v14, 0.0  ;;  %v231_v26 = vmax.f32 %v222_v15, 0.0  ;;  %v357_v15 = vpop.permute.xlu2 %356 }
 0x14a   :  { %v204_v16 = vpop.f32.mrf.mxu2  ;;  %v223_v17 = vpop.f32.mrf.mxu3 }
 0x14b   :  { %v205_v21 = vadd.f32 %v204_v16, %v170_v13  ;;  %v224_v22 = vadd.f32 %v223_v17, %v170_v13  ;;  %v362_v16 = vpop.permute.xlu0 %361 }
 0x14d   :  { %v232_v27 = vmax.f32 %v205_v21, 0.0  ;;  %v233_v28 = vmax.f32 %v224_v22, 0.0 }
 0x14f   :  { %v236_v31 = vpack.c.bf16 %v232_v27, %v230_v25  ;;  %v237_v32 = vpack.c.bf16 %v233_v28, %v231_v26  ;;  %v434_v25 = vpop.permute.xlu1 %433 }
 0x151   :  { %290 = vmatpush.bf16.msrb.mxu0 %v236_v31  ;;  %309 = vmatpush.bf16.msrb.mxu1 %v237_v32  ;;  %v439_v32 = vpop.permute.xlu2 %438 }
 0x153   :  { %v444_v33 = vpop.permute.xlu0 %443 }
 0x155   :  { %291 = vmatpush.bf16.msrb.mxu0 %v234_v35  ;;  %310 = vmatpush.bf16.msrb.mxu1 %v235_v36 }
 0x158   :  { %579 = vmatmul.msk.bf16.vlgmr.msrb.gmra.mxu0 %vm85_vm0, %v615_v37  ;;  %581 = vmatmul.msk.bf16.vlgmr.msrb.gmra.mxu1 %vm85_vm0, %v615_v37 }
 0x168   :  { %580 = vmatmul.msk.bf16.gmra.mxu0 %vm85_vm0, %v616_v38  ;;  %582 = vmatmul.msk.bf16.gmra.mxu1 %vm85_vm0, %v616_v38 }
 0x1d5   :  { %v293_v39 = vpop.f32.mrf.mxu0  ;;  %v312_v40 = vpop.f32.mrf.mxu1 }
 0x1d6   :  { %v294_v57 = vadd.f32 %v293_v39, %v251_v52  ;;  %v313_v58 = vadd.f32 %v312_v40, %v251_v52 }
 0x1d8   :  { %v322_v3 = vmax.f32 %v294_v57, 0.0  ;;  %v323_v4 = vmax.f32 %v313_v58, 0.0  ;;  %v477_v57 = vld [vmem:[%s816_s1] sm:$0x3]  ;;  %v479_v58 = vstv %s819_s4  ;;  %s651_s1 = smov [#allocation3]   ;;  %s506_s4 = sshll.u32 %s820_s5, 4  ;;  %s507_s4 = int_to_ptr.hbm [resolvable:$true] %s506_s4 }
 0x1d9   :  { %s504_s15 = sshll.u32 %s651_s1, 4  ;;  %s505_s15 = int_to_ptr.vmem [resolvable:$true] %s504_s15 }
 0x1dd   :  { %v295_v41 = vpop.f32.mrf.mxu0  ;;  %v314_v42 = vpop.f32.mrf.mxu1 }
 0x1de   :  { %v296_v53 = vadd.f32 %v295_v41, %v256_v47  ;;  %v315_v54 = vadd.f32 %v314_v42, %v256_v47 }
 0x1e0   :  { %v324_v63 = vmax.f32 %v296_v53, 0.0  ;;  %v325_v0 = vmax.f32 %v315_v54, 0.0 }
 0x1e2   :  { %v330_v5 = vpack.c.bf16 %v324_v63, %v322_v3  ;;  %v331_v6 = vpack.c.bf16 %v325_v0, %v323_v4  ;;  %v480_v63 = vmul.f32 %v479_v58, %v477_v57 }
 0x1e4   :  { %v483_v4 = vperm.slane %v480_v63, 1 }
 0x1e5   :  { %v298_v44 = vpop.f32.mrf.mxu0  ;;  %v317_v45 = vpop.f32.mrf.mxu1 }
 0x1e6   :  { %v299_v48 = vadd.f32 %v298_v44, %v261_v43  ;;  %v318_v49 = vadd.f32 %v317_v45, %v261_v43 }
 0x1e8   :  { %v326_v59 = vmax.f32 %v299_v48, 0.0  ;;  %v327_v60 = vmax.f32 %v318_v49, 0.0  ;;  %v449_v48 = vpop.permute.xlu1 %448 }
 0x1ed   :  { %v300_v50 = vpop.f32.mrf.mxu0  ;;  %v319_v51 = vpop.f32.mrf.mxu1 }
 0x1ee   :  { %v301_v55 = vadd.f32 %v300_v50, %v266_v46  ;;  %v320_v56 = vadd.f32 %v319_v51, %v266_v46 }
 0x1f0   :  { %v328_v61 = vmax.f32 %v301_v55, 0.0  ;;  %v329_v62 = vmax.f32 %v320_v56, 0.0 }
 0x1f2   :  { %v332_v1 = vpack.c.bf16 %v328_v61, %v326_v59  ;;  %v333_v2 = vpack.c.bf16 %v329_v62, %v327_v60 }
 0x1f4   :  { %386 = vmatpush.bf16.msrb.mxu2 %v332_v1  ;;  %405 = vmatpush.bf16.msrb.mxu3 %v333_v2 }
 0x1f8   :  { %387 = vmatpush.bf16.msrb.mxu2 %v330_v5  ;;  %406 = vmatpush.bf16.msrb.mxu3 %v331_v6 }
 0x1fb   :  { %599 = vmatmul.msk.bf16.vlgmr.msrb.gmra.mxu2 %vm85_vm0, %v617_v7  ;;  %601 = vmatmul.msk.bf16.vlgmr.msrb.gmra.mxu3 %vm85_vm0, %v617_v7  ;;  %v482_v7 = vperm.slane %v480_v63, 0 }
 0x20b   :  { %600 = vmatmul.msk.bf16.gmra.mxu2 %vm85_vm0, %v618_v8  ;;  %602 = vmatmul.msk.bf16.gmra.mxu3 %vm85_vm0, %v618_v8  ;;  %v494_v8 = vlaneseq }
 0x20d   :  { %vm496_vm2 = vcmp.lt.s32.totalorder %v494_v8, 256 }
 0x27e   :  { %v389_v9 = vpop.f32.mrf.mxu2  ;;  %v408_v10 = vpop.f32.mrf.mxu3 }
 0x27f   :  { %v390_v19 = vadd.f32 %v389_v9, %v347_v11  ;;  %v409_v20 = vadd.f32 %v408_v10, %v347_v11 }
 0x281   :  { %v418_v28 = vmax.f32 %v390_v19, 0.0  ;;  %v419_v29 = vmax.f32 %v409_v20, 0.0 }
 0x283   :  { %v451_v36 = vmul.f32 %v434_v25, %v418_v28  ;;  %v452_v37 = vmul.f32 %v434_v25, %v419_v29 }
 0x286   :  { %v391_v13 = vpop.f32.mrf.mxu2  ;;  %v410_v14 = vpop.f32.mrf.mxu3 }
 0x287   :  { %v392_v17 = vadd.f32 %v391_v13, %v352_v12  ;;  %v411_v18 = vadd.f32 %v410_v14, %v352_v12 }
 0x289   :  { %v420_v26 = vmax.f32 %v392_v17, 0.0  ;;  %v421_v27 = vmax.f32 %v411_v18, 0.0 }
 0x28b   :  { %v453_v34 = vmul.f32 %v439_v32, %v420_v26  ;;  %v454_v35 = vmul.f32 %v439_v32, %v421_v27 }
 0x28d   :  { %v459_v44 = vadd.f32 %v453_v34, %v451_v36  ;;  %v468_v45 = vadd.f32 %v454_v35, %v452_v37 }
 0x28e   :  { %v394_v21 = vpop.f32.mrf.mxu2  ;;  %v413_v22 = vpop.f32.mrf.mxu3 }
 0x28f   :  { %v395_v23 = vadd.f32 %v394_v21, %v357_v15  ;;  %v414_v24 = vadd.f32 %v413_v22, %v357_v15 }
 0x291   :  { %v422_v30 = vmax.f32 %v395_v23, 0.0  ;;  %v423_v31 = vmax.f32 %v414_v24, 0.0 }
 0x293   :  { %v455_v40 = vmul.f32 %v444_v33, %v422_v30  ;;  %v456_v41 = vmul.f32 %v444_v33, %v423_v31 }
 0x295   :  { %v460_v49 = vadd.f32 %v459_v44, %v455_v40  ;;  %v469_v50 = vadd.f32 %v468_v45, %v456_v41 }
 0x296   :  { %v396_v38 = vpop.f32.mrf.mxu2  ;;  %v415_v39 = vpop.f32.mrf.mxu3 }
 0x297   :  { %v397_v42 = vadd.f32 %v396_v38, %v362_v16  ;;  %v416_v43 = vadd.f32 %v415_v39, %v362_v16 }
 0x299   :  { %v424_v46 = vmax.f32 %v397_v42, 0.0  ;;  %v425_v47 = vmax.f32 %v416_v43, 0.0 }
 0x29b   :  { %v457_v51 = vmul.f32 %v449_v48, %v424_v46  ;;  %v458_v52 = vmul.f32 %v449_v48, %v425_v47 }
 0x29d   :  { %v461_v53 = vadd.f32 %v460_v49, %v457_v51  ;;  %v470_v54 = vadd.f32 %v469_v50, %v458_v52 }
 0x29f   :  { %v462_v55 = vrot.slane %v461_v53, 4  ;;  %v471_v56 = vrot.slane %v470_v54, 4 }
 0x2a1   :  { %v463_v59 = vadd.f32 %v462_v55, %v461_v53  ;;  %v472_v60 = vadd.f32 %v471_v56, %v470_v54 }
 0x2a3   :  { %v464_v61 = vrot.slane %v463_v59, 2  ;;  %v473_v62 = vrot.slane %v472_v60, 2 }
 0x2a5   :  { %v465_v0 = vadd.f32 %v464_v61, %v463_v59  ;;  %v474_v1 = vadd.f32 %v473_v62, %v472_v60 }
 0x2a7   :  { %v466_v2 = vrot.slane %v465_v0, 1  ;;  %v475_v3 = vrot.slane %v474_v1, 1 }
 0x2a9   :  { %v476_v5 = vadd.f32 %v475_v3, %v474_v1  ;;  %v467_v6 = vadd.f32 %v466_v2, %v465_v0 }
 0x2ab   :  { %v487_v9 = vadd.f32 %v483_v4, %v476_v5  ;;  %v486_v10 = vadd.f32 %v482_v7, %v467_v6 }
 0x2ad   :  { %v490_v11 = vrot.slane %v487_v9, 7 }
 0x2af   :  { %v492_v12 = vsel %vm491_vm1, %v486_v10, %v490_v11 }
 0x2b0   :  { %498 = vst.msk [vmem:[#allocation3] sm:$0x3] %vm496_vm2, %v492_v12 }
 0x2b1   :  { %509 = dma.vmem_to_hbm [thread:$0]  %s505_s15, 32, %s507_s4, [#allocation4]  }
 0x2b2   :  { %648 = dma.done.wait [#allocation4], 32  }
 0x2b3   :  { %649 = vsyncadd [#allocation4], 4294967264 }
 0x2b4   :  { %514 = vsyncpa [#allocation4], 1 }

</bundles_post_ra>
